<compile_context>
chip_gen: v6e
topology: v6e:2x2x1
jax: 0.10.0
libtpu: 0.0.40
codegen_flags: <defaults>
</compile_context>

<pallas_src>
import functools

import jax
import jax.numpy as jnp
from jax import lax
from jax.experimental import pallas as pl
from jax.experimental.pallas import tpu as pltpu

EPS = 1e-5

_TARGET_BLOCK_BYTES = 2 * 1024 * 1024   # ~2 MiB input block -> ~85% of HBM roofline
_MAX_ROW_TILE = 2048
_LANE = 128


# ---------------------------------------------------------------------------
# Tiling helpers
# ---------------------------------------------------------------------------
def _pack(itemsize):
    # sublane packing of the native dtype
    return {4: 8, 2: 16, 1: 32}.get(itemsize, 8)


def _is_megacore():
    """True only on parts where >1 TensorCore shares the grid (v4 megacore, v7x)."""
    try:
        kind = jax.devices()[0].device_kind.lower()
    except Exception:
        return False
    return ("v4" in kind) or ("v7" in kind) or ("7x" in kind)


def _row_tile_whole(nc, hw, itemsize, target_bytes):
    """Row tile for the whole-row path, sized for HBM efficiency."""
    pack = _pack(itemsize)
    rt = (target_bytes // (hw * itemsize)) // pack * pack
    rt = max(pack, min(rt, _MAX_ROW_TILE))
    nc_up = -(-nc // pack) * pack
    rt = min(rt, nc_up)
    # Only halve the tile to expose >=2 grid steps where a second TensorCore exists;
    # on single-TC chips (v5e/v6e) keep the full tile (less per-step overhead).
    if _is_megacore() and nc_up >= 2 * pack:
        rt = min(rt, max(pack, (nc_up // 2) // pack * pack))
    nc_pad = -(-nc // rt) * rt
    return rt, nc_pad


def _chunk_tile(nc, hw, itemsize, max_block_bytes):
    """(row tile, lane chunk, padded nc, padded hw) for the chunked (large-H*W) path."""
    pack = _pack(itemsize)
    rt = pack                                   # small row tile -> (rt,1) combine ~1 vreg
    ct = max(_LANE, (max_block_bytes // (rt * itemsize)) // _LANE * _LANE)
    hw_up = -(-hw // _LANE) * _LANE
    ct = min(ct, hw_up)
    hw_pad = -(-hw // ct) * ct
    nc_pad = -(-nc // rt) * rt
    return rt, ct, nc_pad, hw_pad


def _vmem_limit_bytes(block_native_bytes, block_f32_bytes):
    # Need-based sizing (review item 8): double-buffered native-dtype input block plus
    # headroom for the f32 cast / centered temporaries, instead of a blanket 32-48 MiB.
    need = 2 * block_native_bytes + 5 * block_f32_bytes + (2 << 20)
    return int(min(56 << 20, max(16 << 20, need)))


# ---------------------------------------------------------------------------
# Kernels
# ---------------------------------------------------------------------------
def _finalize_abs_moments(mean, var, m3):
    """(|mean|, |std|, |skew|) as one (rt,3) array; rsqrt + multiplies, no divide."""
    v = var + EPS
    inv_std = lax.rsqrt(v)                      # single EUP op per row
    std = v * inv_std                           # == sqrt(var + EPS)
    skew = m3 * (inv_std * inv_std * inv_std)   # == m3 / std**3
    return jnp.concatenate([jnp.abs(mean), jnp.abs(std), jnp.abs(skew)], axis=-1)


def _moments_kernel_whole(x_ref, out_ref):
    """Whole spatial extent in one block: centered two-pass moments, single store."""
    x = x_ref[...].astype(jnp.float32)
    hw = x.shape[-1]
    mean = jnp.sum(x, axis=-1, keepdims=True) * (1.0 / hw)
    c = x - mean
    c2 = c * c
    var = jnp.sum(c2, axis=-1, keepdims=True) * (1.0 / (hw - 1))   # unbiased (torch)
    m3 = jnp.sum(c2 * c, axis=-1, keepdims=True) * (1.0 / hw)
    out_ref[...] = _finalize_abs_moments(mean, var, m3)


def _moments_kernel_chunked(x_ref, out_ref, mean_acc, m2_acc, m3_acc,
                            *, hw, ct, needs_mask):
    """HW streamed in lane chunks; Chan et al. pairwise combine of (n, mean, M2, M3)."""
    j = pl.program_id(1)
    nj = pl.num_programs(1)

    @pl.when(j == 0)
    def _():
        mean_acc[...] = jnp.zeros_like(mean_acc)
        m2_acc[...] = jnp.zeros_like(m2_acc)
        m3_acc[...] = jnp.zeros_like(m3_acc)

    x = x_ref[...].astype(jnp.float32)

    one = jnp.ones((1, 1), jnp.float32)
    j_f = j.astype(jnp.float32) * one           # keep count math on the VPU (1,1)
    if needs_mask:
        # only the last chunk can be partial (wrapper zero-pads hw up to a ct multiple)
        col = lax.broadcasted_iota(jnp.int32, x.shape, 1) + j * ct
        valid = col < hw
        n_b = jnp.minimum(float(ct) * one, float(hw) * one - j_f * float(ct))
    else:
        n_b = float(ct) * one

    # chunk statistics (padded columns are zeros -> the raw sum is already correct)
    mean_b = jnp.sum(x, axis=-1, keepdims=True) / n_b
    c = x - mean_b
    if needs_mask:
        c = jnp.where(valid, c, 0.0)
    c2 = c * c
    m2_b = jnp.sum(c2, axis=-1, keepdims=True)
    m3_b = jnp.sum(c2 * c, axis=-1, keepdims=True)

    # numerically stable pairwise combine (Chan et al.); all previous chunks are full
    n_a = j_f * float(ct)
    n = n_a + n_b
    inv_n = 1.0 / n
    delta = mean_b - mean_acc[...]
    w_b = n_b * inv_n
    nanb_n = n_a * w_b                          # n_a * n_b / n
    m2_a = m2_acc[...]
    mean_acc[...] = mean_acc[...] + delta * w_b
    m3_acc[...] = (m3_acc[...] + m3_b
                   + delta * delta * delta * nanb_n * (n_a - n_b) * inv_n
                   + 3.0 * delta * (n_a * m2_b - n_b * m2_a) * inv_n)
    m2_acc[...] = m2_a + m2_b + delta * delta * nanb_n

    @pl.when(j == nj - 1)
    def _():
        var = m2_acc[...] * (1.0 / (hw - 1))    # unbiased (torch); requires hw > 1
        m3 = m3_acc[...] * (1.0 / hw)
        out_ref[...] = _finalize_abs_moments(mean_acc[...], var, m3)


# ---------------------------------------------------------------------------
# pallas_call wrappers
# ---------------------------------------------------------------------------
def _moments_whole_call(x2, rt, hw, itemsize):
    nc_pad = x2.shape[0]
    block_native = rt * hw * itemsize
    block_f32 = rt * hw * 4
    cost = pl.CostEstimate(flops=7 * nc_pad * hw,
                           transcendentals=nc_pad,
                           bytes_accessed=nc_pad * hw * itemsize + nc_pad * 3 * 4)
    return pl.pallas_call(
        _moments_kernel_whole,
        out_shape=jax.ShapeDtypeStruct((nc_pad, 3), jnp.float32),
        grid_spec=pltpu.PrefetchScalarGridSpec(
            num_scalar_prefetch=0,
            grid=(nc_pad // rt,),
            in_specs=[pl.BlockSpec((rt, hw), lambda i: (i, 0))],
            out_specs=pl.BlockSpec((rt, 3), lambda i: (i, 0)),
        ),
        compiler_params=pltpu.CompilerParams(
            dimension_semantics=("parallel",),
            vmem_limit_bytes=_vmem_limit_bytes(block_native, block_f32)),
        cost_estimate=cost,
    )(x2)


def _moments_chunked_call(x2, rt, ct, hw, itemsize):
    nc_pad, hw_pad = x2.shape
    needs_mask = (hw_pad != hw)                 # mask code emitted only when needed
    block_native = rt * ct * itemsize
    block_f32 = rt * ct * 4
    kern = functools.partial(_moments_kernel_chunked, hw=hw, ct=ct, needs_mask=needs_mask)
    cost = pl.CostEstimate(flops=8 * nc_pad * hw_pad,
                           transcendentals=nc_pad,
                           bytes_accessed=nc_pad * hw_pad * itemsize + nc_pad * 3 * 4)
    return pl.pallas_call(
        kern,
        out_shape=jax.ShapeDtypeStruct((nc_pad, 3), jnp.float32),
        grid_spec=pltpu.PrefetchScalarGridSpec(
            num_scalar_prefetch=0,
            grid=(nc_pad // rt, hw_pad // ct),          # reduction (hw) axis last
            in_specs=[pl.BlockSpec((rt, ct), lambda i, j: (i, j))],
            out_specs=pl.BlockSpec((rt, 3), lambda i, j: (i, 0)),
            scratch_shapes=[pltpu.VMEM((rt, 1), jnp.float32)] * 3,
        ),
        compiler_params=pltpu.CompilerParams(
            dimension_semantics=("parallel", "arbitrary"),
            vmem_limit_bytes=_vmem_limit_bytes(block_native, block_f32)),
        cost_estimate=cost,
    )(x2)


def _abs_moments(x4, max_block_bytes=_TARGET_BLOCK_BYTES):
    """Per-(n,c) (|mean|, |std|, |skew|), shape (N*C, 3) float32."""
    n, c, h, w = x4.shape
    nc, hw = n * c, h * w
    itemsize = x4.dtype.itemsize
    pack = _pack(itemsize)
    x2 = x4.reshape(nc, hw)

    if pack * hw * itemsize <= max_block_bytes:
        # whole spatial extent fits a modest block -> single-pass-over-grid path
        rt, nc_pad = _row_tile_whole(nc, hw, itemsize, max_block_bytes)
        if nc_pad != nc:
            x2 = jnp.pad(x2, ((0, nc_pad - nc), (0, 0)))   # zero rows: finite (eps>0)
        mom = _moments_whole_call(x2, rt, hw, itemsize)
    else:
        # large H*W -> stream lane chunks with scratch accumulation (v7x VMEM safe)
        rt, ct, nc_pad, hw_pad = _chunk_tile(nc, hw, itemsize, max_block_bytes)
        if nc_pad != nc or hw_pad != hw:
            x2 = jnp.pad(x2, ((0, nc_pad - nc), (0, hw_pad - hw)))
        mom = _moments_chunked_call(x2, rt, ct, hw, itemsize)

    return mom[:nc]                             # drop padded rows BEFORE any mean


# ---------------------------------------------------------------------------
# Public API (mirrors __init__ / forward of StyleLossMeanStdSkew)
# ---------------------------------------------------------------------------
def style_loss_mean_std_skew_init(target, max_block_bytes=_TARGET_BLOCK_BYTES):
    """Mirrors __init__: per-(n,c) (|mean|, |std|, |skew|) of target, shape (N*C, 3)."""
    return _abs_moments(target, max_block_bytes)


def style_loss_mean_std_skew_forward(x, target_moments, max_block_bytes=_TARGET_BLOCK_BYTES):
    """Mirrors forward(): returns (x, loss). `target_moments` comes from *_init."""
    n, c, h, w = x.shape
    assert target_moments.shape == (n * c, 3), "target_moments must come from *_init"
    in_moments = _abs_moments(x, max_block_bytes)

    # tiny (N*C, 3) epilogue in plain jnp (balancing factors + per-moment MSE)
    factors = jnp.minimum(1.0 / jnp.mean(target_moments, axis=0), 1.0)   # (3,)
    mse = jnp.mean((in_moments - target_moments) ** 2, axis=0)           # (3,)
    loss = jnp.sum(jnp.abs(factors) * mse)
    return x, loss


def style_loss_mean_std_skew(x, target, max_block_bytes=_TARGET_BLOCK_BYTES):
    """Convenience: __init__ + forward in one call (no caching of target stats)."""
    tmom = style_loss_mean_std_skew_init(target, max_block_bytes)
    return style_loss_mean_std_skew_forward(x, tmom, max_block_bytes)


# ---------------------------------------------------------------------------
# Pure-JAX reference for correctness checking.
# ---------------------------------------------------------------------------
def _ref_abs_moments(x):
    n, c, h, w = x.shape
    xf = x.reshape(n * c, h * w).astype(jnp.float32)
    mean = xf.mean(-1, keepdims=True)
    var = xf.var(-1, ddof=1, keepdims=True)
    std = jnp.sqrt(var + EPS)
    skew = (((xf - mean) / std) ** 3).mean(-1, keepdims=True)
    return jnp.abs(mean), jnp.abs(std), jnp.abs(skew)


def _ref_forward(x, target):
    tm, ts, tsk = _ref_abs_moments(target)
    im, istd, isk = _ref_abs_moments(x)
    mbf = jnp.minimum(1.0 / jnp.mean(tm), 1.0)
    sbf = jnp.minimum(1.0 / jnp.mean(ts), 1.0)
    kbf = jnp.minimum(1.0 / jnp.mean(tsk), 1.0)
    loss = (jnp.abs(mbf) * jnp.mean((im - tm) ** 2)
            + jnp.abs(sbf) * jnp.mean((istd - ts) ** 2)
            + jnp.abs(kbf) * jnp.mean((isk - tsk) ** 2))
    return x, loss


if __name__ == "__main__":
    key = jax.random.PRNGKey(0)
    k1, k2, k3, k4 = jax.random.split(key, 4)

    # 1) default whole-row path
    N, C, H, W = 2, 4, 16, 16
    x = jax.random.normal(k1, (N, C, H, W), jnp.float32)
    target = jax.random.normal(k2, (N, C, H, W), jnp.float32) * 2.0 + 0.5
    out, loss = jax.jit(style_loss_mean_std_skew)(x, target)
    jax.block_until_ready((out, loss))
    ref_out, ref_loss = _ref_forward(x, target)
    assert out.shape == x.shape and out.dtype == x.dtype
    assert jnp.allclose(out, ref_out), "forward should return the input unchanged"
    assert jnp.allclose(loss, ref_loss, rtol=1e-4, atol=1e-6), (loss, ref_loss)

    # 2) chunked (HW-tiled) path, forced via a tiny block budget (128-aligned hw, no mask)
    f_small = jax.jit(functools.partial(style_loss_mean_std_skew, max_block_bytes=4096))
    out2, loss2 = f_small(x, target)
    jax.block_until_ready((out2, loss2))
    assert jnp.allclose(out2, ref_out)
    assert jnp.allclose(loss2, ref_loss, rtol=1e-4, atol=1e-6), (loss2, ref_loss)

    # 3) chunked path with a ragged (non-128-multiple) spatial size -> lane masking
    H3, W3 = 13, 13
    x3 = jax.random.normal(k3, (N, C, H3, W3), jnp.float32) + 0.25
    t3 = jax.random.normal(k4, (N, C, H3, W3), jnp.float32) * 1.5 - 0.3
    out3, loss3 = f_small(x3, t3)
    jax.block_until_ready((out3, loss3))
    _, ref_loss3 = _ref_forward(x3, t3)
    assert jnp.allclose(loss3, ref_loss3, rtol=1e-4, atol=1e-6), (loss3, ref_loss3)

    print("KERNEL_OK")
</pallas_src>

<mosaic_0001>
module attributes {stable_mosaic.version = 11 : i64} {
  func.func @_moments_kernel_whole(%arg0: i32, %arg1: memref<8x256xf32, #tpu.memory_space<vmem>>, %arg2: memref<8x3xf32, #tpu.memory_space<vmem>>) attributes {dimension_semantics = [#tpu.dimension_semantics<parallel>], iteration_bounds = array<i64: 1>, scalar_prefetch = 0 : i64, scratch_operands = 0 : i64, tpu.core_type = #tpu.core_type<tc>, window_params = [{transform_indices = @transform_0, window_bounds = array<i64: 8, 256>}, {transform_indices = @transform_1, window_bounds = array<i64: 8, 3>}]} {
    %c0 = arith.constant 0 : index
    %c0_0 = arith.constant 0 : index
    %0 = vector.load %arg1[%c0, %c0_0] : memref<8x256xf32, #tpu.memory_space<vmem>>, vector<8x256xf32>
    %cst = arith.constant dense<0.000000e+00> : vector<8xf32>
    %1 = vector.multi_reduction <add>, %0, %cst [1] : vector<8x256xf32> to vector<8xf32>
    %2 = vector.shape_cast %1 : vector<8xf32> to vector<8x1xf32>
    %cst_1 = arith.constant 3.906250e-03 : f32
    %3 = vector.broadcast %cst_1 : f32 to vector<8x1xf32>
    %4 = arith.mulf %2, %3 : vector<8x1xf32>
    %5 = vector.broadcast %4 : vector<8x1xf32> to vector<8x256xf32>
    %6 = arith.subf %0, %5 : vector<8x256xf32>
    %7 = arith.mulf %6, %6 : vector<8x256xf32>
    %cst_2 = arith.constant dense<0.000000e+00> : vector<8xf32>
    %8 = vector.multi_reduction <add>, %7, %cst_2 [1] : vector<8x256xf32> to vector<8xf32>
    %9 = vector.shape_cast %8 : vector<8xf32> to vector<8x1xf32>
    %cst_3 = arith.constant 0.00392156886 : f32
    %10 = vector.broadcast %cst_3 : f32 to vector<8x1xf32>
    %11 = arith.mulf %9, %10 : vector<8x1xf32>
    %12 = arith.mulf %7, %6 : vector<8x256xf32>
    %cst_4 = arith.constant dense<0.000000e+00> : vector<8xf32>
    %13 = vector.multi_reduction <add>, %12, %cst_4 [1] : vector<8x256xf32> to vector<8xf32>
    %14 = vector.shape_cast %13 : vector<8xf32> to vector<8x1xf32>
    %cst_5 = arith.constant 3.906250e-03 : f32
    %15 = vector.broadcast %cst_5 : f32 to vector<8x1xf32>
    %16 = arith.mulf %14, %15 : vector<8x1xf32>
    %cst_6 = arith.constant 9.99999974E-6 : f32
    %17 = vector.broadcast %cst_6 : f32 to vector<8x1xf32>
    %18 = arith.addf %11, %17 : vector<8x1xf32>
    %19 = math.rsqrt %18 : vector<8x1xf32>
    %20 = arith.mulf %18, %19 : vector<8x1xf32>
    %21 = arith.mulf %19, %19 : vector<8x1xf32>
    %22 = arith.mulf %21, %19 : vector<8x1xf32>
    %23 = arith.mulf %16, %22 : vector<8x1xf32>
    %24 = math.absf %4 : vector<8x1xf32>
    %25 = math.absf %20 : vector<8x1xf32>
    %26 = math.absf %23 : vector<8x1xf32>
    %27 = tpu.concatenate %24, %25, %26 in 1 : vector<8x1xf32>, vector<8x1xf32>, vector<8x1xf32> -> vector<8x3xf32>
    %c0_7 = arith.constant 0 : index
    %c0_8 = arith.constant 0 : index
    %28 = vector.load %arg2[%c0_7, %c0_8] : memref<8x3xf32, #tpu.memory_space<vmem>>, vector<8x3xf32>
    tpu.vector_store %arg2[%c0_7, %c0_8], %27 {strides = array<i32>} : memref<8x3xf32, #tpu.memory_space<vmem>>, vector<8x3xf32>,
    return
  }
  func.func @transform_0(%arg0: i32) -> (i32, i32) {
    %c0_i32 = arith.constant 0 : i32
    %c0_i32_0 = arith.constant 0 : i32
    return %arg0, %c0_i32 : i32, i32
  }
  func.func @transform_1(%arg0: i32) -> (i32, i32) {
    %c0_i32 = arith.constant 0 : i32
    %c0_i32_0 = arith.constant 0 : i32
    return %arg0, %c0_i32 : i32, i32
  }
}

</mosaic_0001>

<bundles_post_ra>
// kernel: style_loss_mean_std_skew.2
= control target key start
LH: loop header
LB: loop body
LE: loop exit
PB: predicated region body
PF: predicated region fallthrough
CT: control target
= control target key end

     0   :  { %vm37_vm0 = vcmask 7168   ;;  %vm39_vm1 = vcmask 15360   ;;  %vm41_vm2 = vcmask 23552   ;;  %s68_s0 = inlined_call_operand.vmem [shape: f32[8,256], index: 0, kind: input, shape index: {}]   ;;  %s69_s1 = inlined_call_operand.vmem [shape: f32[8,3], index: 1, kind: output, shape index: {}]  }
   0x1   :  { %v8_v0 = vld [vmem:[%s68_s0] sm:$0xff]  ;;  %v9_v1 = vld [vmem:[%s68_s0 + $0x8] sm:$0xff] }
   0x2   :  { %v10_v2 = vadd.f32 %v9_v1, %v8_v0 }
   0x4   :  { %11 = vadd.xlane.f32.xlu0 %v10_v2 }
  0x8d   :  { %v12_v3 = vpop.xlane.xlu0 %11 }
  0x8e   :  { %v13_v4 = vmul.f32 0.00390625, %v12_v3 }
  0x90   :  { %v14_v5 = vsub.f32 %v8_v0, %v13_v4  ;;  %v15_v6 = vsub.f32 %v9_v1, %v13_v4  ;;  %v34_v24 = vand.u32 2147483647, %v13_v4 }
  0x92   :  { %v16_v7 = vmul.f32 %v14_v5, %v14_v5  ;;  %v17_v8 = vmul.f32 %v15_v6, %v15_v6 }
  0x94   :  { %v18_v9 = vadd.f32 %v17_v8, %v16_v7  ;;  %v22_v10 = vmul.f32 %v16_v7, %v14_v5  ;;  %v23_v11 = vmul.f32 %v17_v8, %v15_v6 }
  0x96   :  { %19 = vadd.xlane.f32.xlu0 %v18_v9  ;;  %v24_v12 = vadd.f32 %v23_v11, %v22_v10 }
  0x98   :  { %25 = vadd.xlane.f32.xlu1 %v24_v12 }
 0x11f   :  { %v20_v13 = vpop.xlane.xlu0 %19 }
 0x120   :  { %v21_v14 = vmul.f32 0.003921569, %v20_v13 }
 0x121   :  { %v26_v17 = vpop.xlane.xlu1 %25 }
 0x122   :  { %v28_v15 = vadd.f32 1e-05, %v21_v14  ;;  %v27_v20 = vmul.f32 0.00390625, %v26_v17 }
 0x124   :  { %47 = vrsqrt.f32 %v28_v15 }
 0x131   :  { %v48_v16 = vpop.eup %47 }
 0x132   :  { %v30_v18 = vmul.f32 %v48_v16, %v28_v15  ;;  %v31_v19 = vmul.f32 %v48_v16, %v48_v16 }
 0x134   :  { %v32_v21 = vmul.f32 %v48_v16, %v31_v19  ;;  %v35_v22 = vand.u32 2147483647, %v30_v18 }
 0x136   :  { %v33_v23 = vmul.f32 %v32_v21, %v27_v20  ;;  %v38_v26 = vsel %vm37_vm0, %v34_v24, %v35_v22 }
 0x138   :  { %v36_v25 = vand.u32 2147483647, %v33_v23 }
 0x13a   :  { %v40_v27 = vsel %vm39_vm1, %v38_v26, %v36_v25 }
 0x13b   :  { %42 = vst.msk [vmem:[%s69_s1] sm:$0xff] %vm41_vm2, %v40_v27 }

</bundles_post_ra>
